<compile_context>
chip_gen: v7x
topology: tpu7x:2x2x1
jax: 0.10.0
libtpu: 0.0.40
codegen_flags: <defaults>
</compile_context>

<pallas_src>
import functools
import math

import jax
import jax.numpy as jnp
from jax.experimental import pallas as pl
from jax.experimental.pallas import tpu as pltpu

_A = math.sqrt(2.0 / math.pi)        # sqrt(2/pi)
_B = _A * 0.044715                   # folded: sqrt(2/pi) * 0.044715
_LANE = 128


def _gelu_kernel(x_ref, o_ref, *, compute_dtype):
    # 0.5*x*(1 + tanh(sqrt(2/pi)*(x + 0.044715*x^3)))
    #   == x * (0.5 + 0.5*tanh(x*(A + B*x^2)))        (A, B folded at trace time)
    x = x_ref[...].astype(compute_dtype)
    x2 = x * x
    t = jnp.tanh(x * (_A + _B * x2))
    o_ref[...] = (x * (0.5 + 0.5 * t)).astype(o_ref.dtype)


@functools.lru_cache(maxsize=None)
def _device_kind() -> str:
    try:
        return jax.devices()[0].device_kind.lower()
    except Exception:
        return ""


def _is_pre_v6() -> bool:
    kind = _device_kind()
    return any(tag in kind for tag in ("v2", "v3", "v4", "v5"))


def _sublane_granule(dtype) -> int:
    # Packed sublane tile: 8 for 32-bit, 16 for 16-bit, 32 for 8-bit dtypes.
    itemsize = jnp.dtype(dtype).itemsize
    return max(8, 32 // itemsize)


def _gelu_jnp(x):
    xf = x.astype(jnp.float32)
    y = 0.5 * xf * (1.0 + jnp.tanh(_A * (xf + 0.044715 * xf * xf * xf)))
    return y.astype(x.dtype)


def _gelu_2d(x2d, *, target_block_bytes, vmem_limit_bytes):
    rows, lane_w = x2d.shape
    dtype = x2d.dtype
    itemsize = jnp.dtype(dtype).itemsize
    granule = _sublane_granule(dtype)

    # bf16-native compute on v6e/v7x keeps tanh/VALU off the critical path and
    # halves vreg pressure; v5e and older have no native bf16 VPU/EUP path.
    if dtype == jnp.bfloat16 and not _is_pre_v6():
        compute_dtype = jnp.bfloat16
    else:
        compute_dtype = jnp.float32

    # Big row block (~target_block_bytes per buffer) so DMAs are long and the
    # per-step grid overhead is amortized.  in+out double-buffered -> 4x block
    # bytes live VMEM, budgeted against the explicit vmem limit below.
    if rows >= granule:
        tr = max(granule, target_block_bytes // (lane_w * itemsize))
        tr = max(granule, (tr // granule) * granule)
        tr = min(tr, (rows // granule) * granule)   # block never exceeds array
    else:
        tr = rows                                   # full-extent (tiny) block
    grid = (pl.cdiv(rows, tr),)                     # Pallas masks the tail block

    n = rows * lane_w
    return pl.pallas_call(
        functools.partial(_gelu_kernel, compute_dtype=compute_dtype),
        out_shape=jax.ShapeDtypeStruct((rows, lane_w), dtype),
        grid_spec=pltpu.PrefetchScalarGridSpec(
            num_scalar_prefetch=0,
            grid=grid,
            in_specs=[pl.BlockSpec((tr, lane_w), lambda i: (i, 0))],
            out_specs=pl.BlockSpec((tr, lane_w), lambda i: (i, 0)),
        ),
        compiler_params=pltpu.CompilerParams(
            # 'parallel' lets Mosaic shard the row loop across both TCs on v7x;
            # neutral on single-TC v5e/v6e.
            # TODO(synk): confirm in xprof that v7x actually splits this axis
            # across both TensorCores; if not, switch to pltpu.CORE_PARALLEL.
            dimension_semantics=("parallel",),
            # Explicit limit so the larger blocks compile on every generation:
            # 48 MiB < 64 MiB physical on v7x, far under 128 MiB on v5e/v6e.
            vmem_limit_bytes=vmem_limit_bytes,
        ),
        # Advisory hint so XLA schedules this as the memory-bound op it is.
        cost_estimate=pl.CostEstimate(
            flops=7 * n,
            transcendentals=n,
            bytes_accessed=2 * n * itemsize,
        ),
    )(x2d)


def gelu_pallas(x: jax.Array, *, target_block_bytes=None,
                vmem_limit_bytes=48 * 1024 * 1024) -> jax.Array:
    """Elementwise tanh-GELU matching the PyTorch module (any input layout)."""
    orig_shape = x.shape
    n = x.size
    if n == 0:
        return x

    if target_block_bytes is None:
        # v6e/v7x: ~6 MiB/buffer (24 MiB live with in/out double-buffering);
        # v5e and older: ~4 MiB/buffer (slower HBM -> step overhead already small).
        target_block_bytes = (4 if _is_pre_v6() else 6) * 1024 * 1024

    granule = _sublane_granule(x.dtype)
    n_main = (n // _LANE) * _LANE
    rem = n - n_main

    if rem == 0:
        # Aligned (common) case: zero wrapper-side HBM copies.  Pick the widest
        # lane slab that divides n and still leaves >= one sublane granule of rows
        # (longer contiguous vld/vst runs per row).
        lane_w = _LANE
        for lw in (1024, 512, 256):
            if n % lw == 0 and (n // lw) >= granule:
                lane_w = lw
                break
        out2d = _gelu_2d(x.reshape(n // lane_w, lane_w),
                         target_block_bytes=target_block_bytes,
                         vmem_limit_bytes=vmem_limit_bytes)
        return out2d.reshape(orig_shape)

    if n_main == 0:
        # Fewer than 128 elements total: not worth a kernel launch.
        return _gelu_jnp(x).reshape(orig_shape)

    # Ragged case: stream the 128-aligned prefix through the kernel and handle
    # the <128-element remainder with a tiny jnp epilogue (avoids jnp.pad +
    # full-tensor slice, each of which would be an extra HBM pass).
    x_flat = x.reshape(-1)
    out_main = _gelu_2d(x_flat[:n_main].reshape(n_main // _LANE, _LANE),
                        target_block_bytes=target_block_bytes,
                        vmem_limit_bytes=vmem_limit_bytes).reshape(-1)
    out_tail = _gelu_jnp(x_flat[n_main:])
    return jnp.concatenate([out_main, out_tail]).reshape(orig_shape)


def gelu_reference(x: jax.Array) -> jax.Array:
    xf = x.astype(jnp.float32)
    y = 0.5 * xf * (1.0 + jnp.tanh(_A * (xf + 0.044715 * jnp.power(xf, 3))))
    return y.astype(x.dtype)


if __name__ == "__main__":
    key = jax.random.PRNGKey(0)

    # Main case: NCHW f32, batch=2, channels=4, spatial=16x16 (aligned path).
    x = jax.random.normal(key, (2, 4, 16, 16), dtype=jnp.float32)
    out = jax.block_until_ready(gelu_pallas(x))
    ref = gelu_reference(x)
    assert out.shape == x.shape and out.dtype == x.dtype
    assert jnp.allclose(out, ref, atol=1e-5, rtol=1e-5)

    # Non-128-multiple element count -> exercises the ragged epilogue path.
    k1, k2 = jax.random.split(key)
    x_odd = jax.random.normal(k1, (3, 5, 7, 11), dtype=jnp.float32)
    out_odd = jax.block_until_ready(gelu_pallas(x_odd))
    assert jnp.allclose(out_odd, gelu_reference(x_odd), atol=1e-5, rtol=1e-5)

    # bf16 input -> exercises the 16-sublane granule + native-bf16 compute path
    # on v6e/v7x (f32 fallback on v5e and older).
    x_bf16 = jax.random.normal(k2, (2, 4, 16, 16), dtype=jnp.bfloat16)
    out_bf16 = jax.block_until_ready(gelu_pallas(x_bf16))
    ref_bf16 = gelu_reference(x_bf16)
    assert out_bf16.dtype == jnp.bfloat16
    assert jnp.allclose(out_bf16.astype(jnp.float32),
                        ref_bf16.astype(jnp.float32), atol=2e-2, rtol=2e-2)

    print("KERNEL_OK")
</pallas_src>

<mosaic_0001>
module attributes {stable_mosaic.version = 11 : i64} {
  func.func @_gelu_kernel(%arg0: i32, %arg1: memref<8x256xf32, #tpu.memory_space<vmem>>, %arg2: memref<8x256xf32, #tpu.memory_space<vmem>>) attributes {dimension_semantics = [#tpu.dimension_semantics<parallel>], iteration_bounds = array<i64: 1>, scalar_prefetch = 0 : i64, scratch_operands = 0 : i64, tpu.core_type = #tpu.core_type<tc>, window_params = [{transform_indices = @transform_0, window_bounds = array<i64: 8, 256>}, {transform_indices = @transform_1, window_bounds = array<i64: 8, 256>}]} {
    %c0 = arith.constant 0 : index
    %c0_0 = arith.constant 0 : index
    %0 = vector.load %arg1[%c0, %c0_0] : memref<8x256xf32, #tpu.memory_space<vmem>>, vector<8x256xf32>
    %1 = arith.mulf %0, %0 : vector<8x256xf32>
    %cst = arith.constant 0.0356774069 : f32
    %2 = vector.broadcast %cst : f32 to vector<8x256xf32>
    %3 = arith.mulf %2, %1 : vector<8x256xf32>
    %cst_1 = arith.constant 0.797884583 : f32
    %4 = vector.broadcast %cst_1 : f32 to vector<8x256xf32>
    %5 = arith.addf %4, %3 : vector<8x256xf32>
    %6 = arith.mulf %0, %5 : vector<8x256xf32>
    %7 = math.tanh %6 : vector<8x256xf32>
    %cst_2 = arith.constant 5.000000e-01 : f32
    %8 = vector.broadcast %cst_2 : f32 to vector<8x256xf32>
    %9 = arith.mulf %8, %7 : vector<8x256xf32>
    %cst_3 = arith.constant 5.000000e-01 : f32
    %10 = vector.broadcast %cst_3 : f32 to vector<8x256xf32>
    %11 = arith.addf %10, %9 : vector<8x256xf32>
    %12 = arith.mulf %0, %11 : vector<8x256xf32>
    %c0_4 = arith.constant 0 : index
    %c0_5 = arith.constant 0 : index
    %13 = vector.load %arg2[%c0_4, %c0_5] : memref<8x256xf32, #tpu.memory_space<vmem>>, vector<8x256xf32>
    tpu.vector_store %arg2[%c0_4, %c0_5], %12 {strides = array<i32>} : memref<8x256xf32, #tpu.memory_space<vmem>>, vector<8x256xf32>,
    return
  }
  func.func @transform_0(%arg0: i32) -> (i32, i32) {
    %c0_i32 = arith.constant 0 : i32
    %c0_i32_0 = arith.constant 0 : i32
    return %arg0, %c0_i32 : i32, i32
  }
  func.func @transform_1(%arg0: i32) -> (i32, i32) {
    %c0_i32 = arith.constant 0 : i32
    %c0_i32_0 = arith.constant 0 : i32
    return %arg0, %c0_i32 : i32, i32
  }
}

</mosaic_0001>

<bundles_post_ra>
// kernel: tpu_custom_call.1
= control target key start
LH: loop header
LB: loop body
LE: loop exit
PB: predicated region body
PF: predicated region fallthrough
CT: control target
= control target key end

     0   :  { %6 = vsyncpa [#allocation3], 0  ;;  %s146_s0 = inlined_call_operand.hbm [shape: f32[8,256], index: 0, kind: input, shape index: {}]   ;;  %s147_s1 = inlined_call_operand.hbm [shape: f32[8,256], index: 1, kind: output, shape index: {}]  }
   0x1   :  { %7 = vsyncpa [#allocation4], 0  ;;  %s110_s6 = smov [#allocation2]   ;;  %s62_s10 = scalar_lea.hbm %s146_s0, 256 }
   0x2   :  { %s14_s7 = sshll.u32 %s110_s6, 4  ;;  %p63_p0 = scmp.ne.s32.totalorder %s146_s0, %s62_s10  ;;  %s15_s7 = int_to_ptr.vmem [resolvable:$true] %s14_s7 }
   0x3   :  { %p66_p1 = scmp.lt.u32.totalorder %s62_s10, %s146_s0 }
   0x5   :  { %p68_p2 = pnand %p66_p1, %p63_p0 }
   0x7   :  { %71 = shalt.err (!%p68_p2)
}
   0x8   :  { %s72_s15 = scalar_lea.vmem %s15_s7, 256  ;;  %p77_p4 = scmp.lt.s32.totalorder %s15_s7, %s15_s7 }
   0x9   :  { %p73_p3 = scmp.ne.s32.totalorder %s15_s7, %s72_s15  ;;  %p78_p5 = scmp.lt.s32.totalorder %s72_s15, %s72_s15 }
   0xb   :  { %p79_p6 = por %p78_p5, %p77_p4 }
   0xd   :  { %p80_p7 = pnand %p79_p6, %p73_p3 }
   0xf   :  { %83 = shalt.err (!%p80_p7)
}
  0x10   :  { %17 = dma.hbm_to_vmem [thread:$0]  %s146_s0, 256, %s15_s7, [#allocation3]  }
  0x11   :  { %106 = dma.done.wait [#allocation3], 256  }
  0x12   :  { %107 = vsyncadd [#allocation3], 4294967040  ;;  %v21_v0 = vld [vmem:[#allocation2] sm:$0xff]  ;;  %v22_v1 = vld [vmem:[#allocation2 + $0x8] sm:$0xff]  ;;  %s111_s0 = smov [#allocation5]  }
  0x13   :  { %v23_v2 = vmul.f32 %v21_v0, %v21_v0  ;;  %v24_v3 = vmul.f32 %v22_v1, %v22_v1  ;;  %s47_s18 = sshll.u32 %s111_s0, 4  ;;  %s48_s18 = int_to_ptr.vmem [resolvable:$true] %s47_s18 }
  0x14   :  { %s84_s19 = scalar_lea.vmem %s48_s18, 256  ;;  %p89_p9 = scmp.lt.s32.totalorder %s48_s18, %s48_s18 }
  0x15   :  { %v25_v4 = vmul.f32 0.035677407, %v23_v2  ;;  %v26_v5 = vmul.f32 0.035677407, %v24_v3  ;;  %p85_p8 = scmp.ne.s32.totalorder %s48_s18, %s84_s19  ;;  %p90_p10 = scmp.lt.s32.totalorder %s84_s19, %s84_s19 }
  0x17   :  { %v27_v6 = vadd.f32 0.7978846, %v25_v4  ;;  %v28_v7 = vadd.f32 0.7978846, %v26_v5  ;;  %p91_p11 = por %p90_p10, %p89_p9 }
  0x19   :  { %v29_v8 = vmul.f32 %v27_v6, %v21_v0  ;;  %v30_v9 = vmul.f32 %v28_v7, %v22_v1  ;;  %p92_p12 = pnand %p91_p11, %p85_p8 }
  0x1b   :  { %58 = vtanh.f32 %v29_v8 }
  0x1c   :  { %60 = vtanh.f32 %v30_v9 }
  0x25   :  { %v59_v10 = vpop.eup %58 }
  0x26   :  { %v61_v11 = vpop.eup %60  ;;  %v33_v12 = vmul.f32 0.5, %v59_v10 }
  0x27   :  { %v34_v13 = vmul.f32 0.5, %v61_v11 }
  0x28   :  { %v35_v14 = vadd.f32 0.5, %v33_v12 }
  0x29   :  { %v36_v15 = vadd.f32 0.5, %v34_v13 }
  0x2a   :  { %v37_v16 = vmul.f32 %v35_v14, %v21_v0 }
  0x2b   :  { %v38_v17 = vmul.f32 %v36_v15, %v22_v1 }
  0x2c   :  { %39 = vst [vmem:[#allocation5] sm:$0xff] %v37_v16 }
  0x2d   :  { %40 = vst [vmem:[#allocation5 + $0x8] sm:$0xff] %v38_v17 }
  0x2e   :  { %95 = shalt.err (!%p92_p12)
}
  0x2f   :  { %s96_s22 = scalar_lea.hbm %s147_s1, 256 }
  0x30   :  { %p97_p13 = scmp.ne.s32.totalorder %s147_s1, %s96_s22  ;;  %p100_p0 = scmp.lt.u32.totalorder %s96_s22, %s147_s1 }
  0x32   :  { %p102_p1 = pnand %p100_p0, %p97_p13 }
  0x34   :  { %105 = shalt.err (!%p102_p1)
}
  0x35   :  { %50 = dma.vmem_to_hbm [thread:$0]  %s48_s18, 256, %s147_s1, [#allocation4]  }
  0x36   :  { %108 = dma.done.wait [#allocation4], 256  }
  0x37   :  { %109 = vsyncadd [#allocation4], 4294967040 }
  0x38   :  { %54 = vsyncpa [#allocation3], 1 }
  0x39   :  { %55 = vsyncpa [#allocation4], 1 }

</bundles_post_ra>
